<compile_context>
chip_gen: v5e
topology: v5e:2x2
jax: 0.10.0
libtpu: 0.0.40
codegen_flags: <defaults>
</compile_context>

<pallas_src>
import jax
import jax.numpy as jnp
from jax.experimental import pallas as pl
from jax.experimental.pallas import tpu as pltpu

IN_FEATURES = 1 * 54 * 46   # 2484
HIDDEN = 256
OUT_FEATURES = 1

_MIN_MEGACORE_ROWS = 2 * 128   # below this batch size a single tile is used


def _round_up(x, m):
    return ((x + m - 1) // m) * m


# ---------------------------------------------------------------------------
# Kernels
# ---------------------------------------------------------------------------
def _fused_kernel(x_ref, weff_ref, beff_ref, o_ref):
    # x_ref : (TM, 2484)   weff_ref : (1, 2484)   beff_ref : (1,) in SMEM
    # o_ref : (TM, 1)
    x = x_ref[...].astype(jnp.float32)                       # in-VMEM cast (bf16 x ok)
    out = jnp.sum(x * weff_ref[...], axis=-1, keepdims=True) + beff_ref[0]
    o_ref[...] = out.astype(o_ref.dtype)


def _two_layer_kernel(x_ref, w1_ref, b1_ref, w2r_ref, b2_ref, o_ref):
    # x_ref : (TM, 2484)    w1_ref : (2484, 256)   b1_ref : (1, 256)
    # w2r_ref: (1, 256)     b2_ref : (1,) in SMEM  o_ref  : (TM, 1)
    x = x_ref[...].astype(w1_ref.dtype)        # bf16 MXU path when W1 is stored bf16
    h = jnp.dot(x, w1_ref[...], preferred_element_type=jnp.float32)
    h = h + b1_ref[...].astype(jnp.float32)
    # Second layer (256 -> 1) as a lane-dense VPU multiply + row reduction instead of an
    # N=1 MXU matmul (which would waste 255/256 MXU columns).
    out = jnp.sum(h * w2r_ref[...].astype(jnp.float32), axis=-1, keepdims=True)
    o_ref[...] = (out + b2_ref[0]).astype(o_ref.dtype)
    # NOTE: a lane-dense (1, TM) output layout would remove the masked (TM, 1) column
    # store, but output bytes are negligible vs. x traffic here; deferred pending a
    # bundle-dump showing vst.msk on the critical path.


# ---------------------------------------------------------------------------
# Tiling / batch prep
# ---------------------------------------------------------------------------
def _choose_tiling(B, tm_max):
    """Pick (tm, Bp):
       * sublane-aligned tile (multiple of 8 rows),
       * >= 2 and an even number of grid steps when B >= 256 (v7x megacore split),
       * padding bounded to < 8 rows per tile (mem-bound kernel: padded rows are
         wasted DMA)."""
    tm_max = max(8, (tm_max // 8) * 8)
    n = pl.cdiv(B, tm_max)
    if B >= _MIN_MEGACORE_ROWS:
        n = max(n, 2)                 # both TensorCores get work on v7x
    if n > 1 and n % 2:
        n += 1                        # even step count -> no tail imbalance across 2 TCs
    tm = min(tm_max, _round_up(pl.cdiv(B, n), 8))
    Bp = pl.cdiv(B, tm) * tm
    return tm, Bp


def _prep_batch(global_state, tm_max):
    """Flatten to (B, 2484) and pad the batch to a multiple of the chosen tile."""
    B = global_state.shape[0]
    x = global_state.reshape(B, -1)
    assert x.shape[1] == IN_FEATURES
    # Keep bf16 activations if the producer already emits them (halves x HBM traffic;
    # kernels cast in-VMEM).  Never add a standalone HBM cast pass here.
    if x.dtype not in (jnp.float32, jnp.bfloat16):
        x = x.astype(jnp.float32)
    tm, Bp = _choose_tiling(B, tm_max)
    if Bp != B:
        x = jnp.pad(x, ((0, Bp - B), (0, 0)))
    return x, B, Bp, tm


def _resident_spec(block_shape, single_buffer):
    """BlockSpec for a grid-invariant (weight/bias) block.

    Constant index_map keeps the block VMEM-resident across the whole grid;
    pl.Buffered(1) drops the pointless second pipeline buffer (saves VMEM —
    notably W1's 2.43 MiB on the two-layer path)."""
    index_map = lambda i: (0, 0)
    if single_buffer and hasattr(pl, "Buffered"):
        try:
            return pl.BlockSpec(block_shape, index_map, pipeline_mode=pl.Buffered(1))
        except TypeError:  # older jax without pipeline_mode kwarg
            pass
    return pl.BlockSpec(block_shape, index_map)


_COMPILER_PARAMS = pltpu.CompilerParams(
    dimension_semantics=("parallel",),          # batch axis shardable across v7x's 2 TCs
    vmem_limit_bytes=32 * 1024 * 1024,          # conservative: fits v7x's 64 MiB VMEM
)


# ---------------------------------------------------------------------------
# Production path: fused affine map
# ---------------------------------------------------------------------------
def fuse_f_network_params(w1, b1, w2, b2):
    """Fold the two Linear layers (no nonlinearity between them) into one affine map.
    Call ONCE per target-network sync, not per forward.

    w_eff = (w1 @ w2) as a (1, 2484) row;  b_eff = b1 @ w2 + b2, shape (1,).
    Exact up to f32 reassociation."""
    w_eff = (w1 @ w2).reshape(1, IN_FEATURES).astype(jnp.float32)
    b_eff = ((b1 @ w2).reshape(-1) + b2.reshape(-1)).astype(jnp.float32)
    return w_eff, b_eff


def target_f_network_forward(global_state, w_eff, b_eff, *, tm=1024,
                             single_buffer_weights=True):
    """Production forward: single fused affine map; streams x + ~10 KB of weights.

    global_state: (B, 1, 54, 46);  returns (B, 1) float32."""
    x, B, Bp, tm = _prep_batch(global_state, tm)
    out = pl.pallas_call(
        _fused_kernel,
        out_shape=jax.ShapeDtypeStruct((Bp, OUT_FEATURES), jnp.float32),
        grid=(Bp // tm,),
        in_specs=[
            pl.BlockSpec((tm, IN_FEATURES), lambda i: (i, 0)),        # x tile streams
            _resident_spec((1, IN_FEATURES), single_buffer_weights),  # w_eff resident
            pl.BlockSpec(memory_space=pltpu.MemorySpace.SMEM),        # b_eff scalar
        ],
        out_specs=pl.BlockSpec((tm, OUT_FEATURES), lambda i: (i, 0)),
        compiler_params=_COMPILER_PARAMS,
    )(x, w_eff, b_eff.reshape(-1).astype(jnp.float32))
    return out[:B]


# ---------------------------------------------------------------------------
# Parity / debug path: faithful two-layer form
# ---------------------------------------------------------------------------
def target_f_network_forward_two_layer(global_state, w1, b1, w2, b2, *, tm=512,
                                       use_bf16_mxu=False,
                                       single_buffer_weights=True):
    """Two-matmul form keeping the module's parameterization (for bit-comparison tests).

    use_bf16_mxu=True casts W1 (here) and the x tile (in-kernel) to bf16 for the MXU
    with f32 accumulation — recommended on v5e where the f32 matmul is MXU-bound.
    It changes numerics slightly; keep it off for exact-parity checks."""
    x, B, Bp, tm = _prep_batch(global_state, tm)
    mxu_dtype = jnp.bfloat16 if use_bf16_mxu else jnp.float32
    w1c = w1.astype(mxu_dtype)
    b1c = b1.reshape(1, HIDDEN).astype(jnp.float32)
    w2_row = w2.reshape(1, HIDDEN).astype(jnp.float32)   # (256, 1) -> lane-dense row
    b2c = b2.reshape(-1).astype(jnp.float32)

    out = pl.pallas_call(
        _two_layer_kernel,
        out_shape=jax.ShapeDtypeStruct((Bp, OUT_FEATURES), jnp.float32),
        grid=(Bp // tm,),
        in_specs=[
            pl.BlockSpec((tm, IN_FEATURES), lambda i: (i, 0)),             # x streams
            _resident_spec((IN_FEATURES, HIDDEN), single_buffer_weights),  # W1 resident
            _resident_spec((1, HIDDEN), single_buffer_weights),            # b1 resident
            _resident_spec((1, HIDDEN), single_buffer_weights),            # w2 row resident
            pl.BlockSpec(memory_space=pltpu.MemorySpace.SMEM),             # b2 scalar
        ],
        out_specs=pl.BlockSpec((tm, OUT_FEATURES), lambda i: (i, 0)),
        compiler_params=_COMPILER_PARAMS,
    )(x, w1c, b1c, w2_row, b2c)
    return out[:B]


# ---------------------------------------------------------------------------
# Init (mirrors nn.Linear's U(-1/sqrt(fan_in), 1/sqrt(fan_in)))
# ---------------------------------------------------------------------------
def init_params(key):
    k1, k2, k3, k4 = jax.random.split(key, 4)
    bound1 = 1.0 / jnp.sqrt(float(IN_FEATURES))
    bound2 = 1.0 / jnp.sqrt(float(HIDDEN))
    # Stored as (in, out) so the kernel does x @ W directly.
    w1 = jax.random.uniform(k1, (IN_FEATURES, HIDDEN), jnp.float32, -bound1, bound1)
    b1 = jax.random.uniform(k2, (1, HIDDEN), jnp.float32, -bound1, bound1)
    w2 = jax.random.uniform(k3, (HIDDEN, OUT_FEATURES), jnp.float32, -bound2, bound2)
    b2 = jax.random.uniform(k4, (OUT_FEATURES,), jnp.float32, -bound2, bound2)
    return w1, b1, w2, b2


if __name__ == "__main__":
    key = jax.random.PRNGKey(0)
    pkey, xkey = jax.random.split(key)
    w1, b1, w2, b2 = init_params(pkey)

    # Small batch; spatial dims are fixed by the module (1, 54, 46).
    B = 2
    global_state = jax.random.normal(xkey, (B, 1, 54, 46), dtype=jnp.float32)

    # Plain-JAX reference (same math, no Pallas).
    ref = global_state.reshape(B, -1) @ w1 + b1
    ref = ref @ w2 + b2
    assert ref.shape == (B, OUT_FEATURES)

    def _run(fn, *args, **kw):
        try:
            return jax.block_until_ready(fn(*args, **kw))
        except Exception:
            # Fallback for JAX versions where pl.Buffered(1) doesn't lower.
            return jax.block_until_ready(fn(*args, single_buffer_weights=False, **kw))

    # 1) Production fused path (weights folded once, as at a target-network sync).
    w_eff, b_eff = fuse_f_network_params(w1, b1, w2, b2)
    out_fused = _run(target_f_network_forward, global_state, w_eff, b_eff)
    assert out_fused.shape == (B, OUT_FEATURES)
    assert jnp.allclose(out_fused, ref, atol=1e-3, rtol=1e-3)

    # 2) Two-layer parity path (f32 MXU).
    out_2l = _run(target_f_network_forward_two_layer, global_state, w1, b1, w2, b2)
    assert out_2l.shape == (B, OUT_FEATURES)
    assert jnp.allclose(out_2l, ref, atol=1e-3, rtol=1e-3)

    # 3) Two-layer bf16-MXU variant (v5e recommendation), looser tolerance.
    out_bf16 = _run(target_f_network_forward_two_layer, global_state, w1, b1, w2, b2,
                    use_bf16_mxu=True)
    assert out_bf16.shape == (B, OUT_FEATURES)
    assert jnp.allclose(out_bf16, ref, atol=5e-2, rtol=5e-2)

    print("KERNEL_OK")
</pallas_src>

<mosaic_0001>
module attributes {stable_mosaic.version = 11 : i64} {
  func.func @_fused_kernel(%arg0: i32, %arg1: memref<8x2484xf32, #tpu.memory_space<vmem>>, %arg2: memref<1x2484xf32, #tpu.memory_space<vmem>>, %arg3: memref<1xf32, #tpu.memory_space<smem>>, %arg4: memref<8x1xf32, #tpu.memory_space<vmem>>) attributes {dimension_semantics = [#tpu.dimension_semantics<parallel>], iteration_bounds = array<i64: 1>, scalar_prefetch = 0 : i64, scratch_operands = 0 : i64, tpu.core_type = #tpu.core_type<tc>, window_params = [{transform_indices = @transform_0, window_bounds = array<i64: 8, 2484>}, {pipeline_mode = #tpu.pipeline_mode<synchronous>, transform_indices = @transform_1, window_bounds = array<i64: 1, 2484>}, {transform_indices = @transform_2, window_bounds = array<i64: 1>}, {transform_indices = @transform_3, window_bounds = array<i64: 8, 1>}]} {
    %c0 = arith.constant 0 : index
    %c0_0 = arith.constant 0 : index
    %0 = vector.load %arg1[%c0, %c0_0] : memref<8x2484xf32, #tpu.memory_space<vmem>>, vector<8x2484xf32>
    %c0_1 = arith.constant 0 : index
    %c0_2 = arith.constant 0 : index
    %1 = vector.load %arg2[%c0_1, %c0_2] : memref<1x2484xf32, #tpu.memory_space<vmem>>, vector<1x2484xf32>
    %2 = vector.broadcast %1 : vector<1x2484xf32> to vector<8x2484xf32>
    %3 = arith.mulf %0, %2 : vector<8x2484xf32>
    %cst = arith.constant dense<0.000000e+00> : vector<8xf32>
    %4 = vector.multi_reduction <add>, %3, %cst [1] : vector<8x2484xf32> to vector<8xf32>
    %5 = vector.shape_cast %4 : vector<8xf32> to vector<8x1xf32>
    %c0_3 = arith.constant 0 : index
    %6 = memref.load %arg3[%c0_3] : memref<1xf32, #tpu.memory_space<smem>>
    %7 = vector.broadcast %6 : f32 to vector<8x1xf32>
    %8 = arith.addf %5, %7 : vector<8x1xf32>
    %c0_4 = arith.constant 0 : index
    %c0_5 = arith.constant 0 : index
    %9 = vector.load %arg4[%c0_4, %c0_5] : memref<8x1xf32, #tpu.memory_space<vmem>>, vector<8x1xf32>
    tpu.vector_store %arg4[%c0_4, %c0_5], %8 {strides = array<i32>} : memref<8x1xf32, #tpu.memory_space<vmem>>, vector<8x1xf32>,
    return
  }
  func.func @transform_0(%arg0: i32) -> (i32, i32) {
    %c0_i32 = arith.constant 0 : i32
    %c0_i32_0 = arith.constant 0 : i32
    return %arg0, %c0_i32 : i32, i32
  }
  func.func @transform_1(%arg0: i32) -> (i32, i32) {
    %c0_i32 = arith.constant 0 : i32
    %c0_i32_0 = arith.constant 0 : i32
    %c0_i32_1 = arith.constant 0 : i32
    return %c0_i32, %c0_i32_0 : i32, i32
  }
  func.func @transform_2(%arg0: i32) -> i32 {
    %c0_i32 = arith.constant 0 : i32
    %c0_i32_0 = arith.constant 0 : i32
    return %c0_i32 : i32
  }
  func.func @transform_3(%arg0: i32) -> (i32, i32) {
    %c0_i32 = arith.constant 0 : i32
    %c0_i32_0 = arith.constant 0 : i32
    return %arg0, %c0_i32 : i32, i32
  }
}

module attributes {stable_mosaic.version = 11 : i64} {
  func.func @_fused_kernel(%arg0: i32, %arg1: memref<8x2484xf32, #tpu.memory_space<vmem>>, %arg2: memref<1x2484xf32, #tpu.memory_space<vmem>>, %arg3: memref<1xf32, #tpu.memory_space<smem>>, %arg4: memref<8x1xf32, #tpu.memory_space<vmem>>) attributes {dimension_semantics = [#tpu.dimension_semantics<parallel>], iteration_bounds = array<i64: 1>, scalar_prefetch = 0 : i64, scratch_operands = 0 : i64, tpu.core_type = #tpu.core_type<tc>, window_params = [{transform_indices = @transform_0, window_bounds = array<i64: 8, 2484>}, {pipeline_mode = #tpu.pipeline_mode<synchronous>, transform_indices = @transform_1, window_bounds = array<i64: 1, 2484>}, {transform_indices = @transform_2, window_bounds = array<i64: 1>}, {transform_indices = @transform_3, window_bounds = array<i64: 8, 1>}]} {
    %c0 = arith.constant 0 : index
    %c0_0 = arith.constant 0 : index
    %0 = vector.load %arg1[%c0, %c0_0] : memref<8x2484xf32, #tpu.memory_space<vmem>>, vector<8x2484xf32>
    %c0_1 = arith.constant 0 : index
    %c0_2 = arith.constant 0 : index
    %1 = vector.load %arg2[%c0_1, %c0_2] : memref<1x2484xf32, #tpu.memory_space<vmem>>, vector<1x2484xf32>
    %2 = vector.broadcast %1 : vector<1x2484xf32> to vector<8x2484xf32>
    %3 = arith.mulf %0, %2 : vector<8x2484xf32>
    %cst = arith.constant dense<0.000000e+00> : vector<8xf32>
    %4 = vector.multi_reduction <add>, %3, %cst [1] : vector<8x2484xf32> to vector<8xf32>
    %5 = vector.shape_cast %4 : vector<8xf32> to vector<8x1xf32>
    %c0_3 = arith.constant 0 : index
    %6 = memref.load %arg3[%c0_3] : memref<1xf32, #tpu.memory_space<smem>>
    %7 = vector.broadcast %6 : f32 to vector<8x1xf32>
    %8 = arith.addf %5, %7 : vector<8x1xf32>
    %c0_4 = arith.constant 0 : index
    %c0_5 = arith.constant 0 : index
    %9 = vector.load %arg4[%c0_4, %c0_5] : memref<8x1xf32, #tpu.memory_space<vmem>>, vector<8x1xf32>
    tpu.vector_store %arg4[%c0_4, %c0_5], %8 {strides = array<i32>} : memref<8x1xf32, #tpu.memory_space<vmem>>, vector<8x1xf32>,
    return
  }
  func.func @transform_0(%arg0: i32) -> (i32, i32) {
    %c0_i32 = arith.constant 0 : i32
    %c0_i32_0 = arith.constant 0 : i32
    return %arg0, %c0_i32 : i32, i32
  }
  func.func @transform_1(%arg0: i32) -> (i32, i32) {
    %c0_i32 = arith.constant 0 : i32
    %c0_i32_0 = arith.constant 0 : i32
    %c0_i32_1 = arith.constant 0 : i32
    return %c0_i32, %c0_i32_0 : i32, i32
  }
  func.func @transform_2(%arg0: i32) -> i32 {
    %c0_i32 = arith.constant 0 : i32
    %c0_i32_0 = arith.constant 0 : i32
    return %c0_i32 : i32
  }
  func.func @transform_3(%arg0: i32) -> (i32, i32) {
    %c0_i32 = arith.constant 0 : i32
    %c0_i32_0 = arith.constant 0 : i32
    return %arg0, %c0_i32 : i32, i32
  }
}

</mosaic_0001>

<bundles_post_ra>
// kernel: tpu_custom_call.1
= control target key start
LH: loop header
LB: loop body
LE: loop exit
PB: predicated region body
PF: predicated region fallthrough
CT: control target
= control target key end

     0   :  { %9 = vsyncpa [#allocation4], 0  ;;  %s251_s0 = inlined_call_operand.hbm [shape: f32[8,2484], index: 0, kind: input, shape index: {}]   ;;  %s252_s1 = inlined_call_operand.hbm [shape: f32[1,2484], index: 1, kind: input, shape index: {}]   ;;  %s253_s2 = inlined_call_operand.<no memory space> [shape: f32[1], index: 2, kind: input, shape index: {}]   ;;  %s254_s3 = inlined_call_operand.vmem [shape: f32[8,1], index: 3, kind: output, shape index: {}]  }
   0x1   :  { %s16_s14 = sshll.u32 %s251_s0, 4  ;;  %s17_s14 = int_to_ptr.hbm [resolvable:$true] %s16_s14 }
   0x2   :  { %10 = vsyncpa [#allocation6], 0  ;;  %s217_s15 = smov [#allocation3]   ;;  %s27_s19 = sshll.u32 %s252_s1, 4  ;;  %s28_s19 = int_to_ptr.hbm [resolvable:$true] %s27_s19 }
   0x3   :  { %s18_s16 = sshll.u32 %s217_s15, 4  ;;  %s218_s20 = smov [#allocation5]   ;;  %s19_s16 = int_to_ptr.vmem [resolvable:$true] %s18_s16 }
   0x4   :  { %21 = dma.hbm_to_vmem [thread:$0]  %s17_s14, 2560, %s19_s16, [#allocation4]  }
   0x5   :  { %s29_s21 = sshll.u32 %s218_s20, 4  ;;  %s30_s21 = int_to_ptr.vmem [resolvable:$true] %s29_s21 }
   0x6   :  { %32 = dma.hbm_to_vmem [thread:$0]  %s28_s19, 320, %s30_s21, [#allocation6]  }
   0x7   :  { %213 = dma.done.wait [#allocation4], 2560  }
   0x8   :  { %214 = vsyncadd [#allocation4], 4294964736 }
   0x9   :  { %215 = dma.done.wait [#allocation6], 320  }
   0xa   :  { %216 = vsyncadd [#allocation6], 4294966976  ;;  %v63_v0 = vld [vmem:[#allocation5] sm:$0xff]  ;;  %v44_v4 = vld [vmem:[#allocation3 + $0x8] sm:$0xff]  ;;  %vm147_vm0 = vcmask 424960   ;;  %vm155_vm1 = vcmask 7168  }
   0xb   :  { %v69_v1 = vperm.slane %v63_v0, 0  ;;  %v70_v2 = vperm.slane %v63_v0, 1  ;;  %v43_v3 = vld [vmem:[#allocation3] sm:$0xff]  ;;  %v71_v5 = vperm.slane %v63_v0, 2  ;;  %v45_v6 = vld [vmem:[#allocation3 + $0x10] sm:$0xff]  ;;  %v72_v7 = vperm.slane %v63_v0, 3 }
   0xc   :  { %v46_v10 = vld [vmem:[#allocation3 + $0x18] sm:$0xff]  ;;  %v73_v11 = vperm.slane %v63_v0, 4  ;;  %v47_v13 = vld [vmem:[#allocation3 + $0x20] sm:$0xff]  ;;  %v74_v14 = vperm.slane %v63_v0, 5  ;;  %v48_v17 = vld [vmem:[#allocation3 + $0x28] sm:$0xff]  ;;  %v75_v18 = vperm.slane %v63_v0, 6 }
   0xd   :  { %v109_v8 = vmul.f32 %v69_v1, %v43_v3  ;;  %v110_v9 = vmul.f32 %v70_v2, %v44_v4  ;;  %v111_v12 = vmul.f32 %v71_v5, %v45_v6  ;;  %v112_v15 = vmul.f32 %v72_v7, %v46_v10  ;;  %v49_v21 = vld [vmem:[#allocation3 + $0x30] sm:$0xff]  ;;  %v64_v22 = vld [vmem:[#allocation5 + $0x8] sm:$0xff]  ;;  %v50_v26 = vld [vmem:[#allocation3 + $0x38] sm:$0xff] }
   0xe   :  { %v113_v19 = vmul.f32 %v73_v11, %v47_v13  ;;  %v76_v23 = vperm.slane %v63_v0, 7  ;;  %v114_v24 = vmul.f32 %v74_v14, %v48_v17  ;;  %v77_v27 = vperm.slane %v64_v22, 0  ;;  %v51_v30 = vld [vmem:[#allocation3 + $0x40] sm:$0xff]  ;;  %v52_v34 = vld [vmem:[#allocation3 + $0x48] sm:$0xff]  ;;  %v53_v38 = vld [vmem:[#allocation3 + $0x50] sm:$0xff] }
   0xf   :  { %v129_v16 = vadd.f32 %v110_v9, %v109_v8  ;;  %v115_v28 = vmul.f32 %v75_v18, %v49_v21  ;;  %v78_v31 = vperm.slane %v64_v22, 1  ;;  %v79_v35 = vperm.slane %v64_v22, 2  ;;  %v54_v42 = vld [vmem:[#allocation3 + $0x58] sm:$0xff]  ;;  %v55_v46 = vld [vmem:[#allocation3 + $0x60] sm:$0xff]  ;;  %v56_v50 = vld [vmem:[#allocation3 + $0x68] sm:$0xff] }
  0x10   :  { %v116_v32 = vmul.f32 %v76_v23, %v50_v26  ;;  %v117_v36 = vmul.f32 %v77_v27, %v51_v30  ;;  %v80_v39 = vperm.slane %v64_v22, 3  ;;  %v81_v43 = vperm.slane %v64_v22, 4  ;;  %v57_v54 = vld [vmem:[#allocation3 + $0x70] sm:$0xff]  ;;  %v58_v59 = vld [vmem:[#allocation3 + $0x78] sm:$0xff]  ;;  %v59_v63 = vld [vmem:[#allocation3 + $0x80] sm:$0xff] }
  0x11   :  { %v130_v20 = vadd.f32 %v129_v16, %v111_v12  ;;  %v118_v40 = vmul.f32 %v78_v31, %v52_v34  ;;  %v119_v44 = vmul.f32 %v79_v35, %v53_v38  ;;  %v82_v47 = vperm.slane %v64_v22, 5  ;;  %v65_v55 = vld [vmem:[#allocation5 + $0x10] sm:$0xf]  ;;  %v60_v3 = vld [vmem:[#allocation3 + $0x88] sm:$0xff]  ;;  %v62_v5 = vld [vmem:[#allocation3 + $0x98] sm:$0xff] }
  0x12   :  { %v120_v48 = vmul.f32 %v80_v39, %v54_v42  ;;  %v83_v51 = vperm.slane %v64_v22, 6  ;;  %v121_v52 = vmul.f32 %v81_v43, %v55_v46  ;;  %v84_v56 = vperm.slane %v64_v22, 7  ;;  %v61_v9 = vld [vmem:[#allocation3 + $0x90] sm:$0xff] }
  0x13   :  { %v131_v25 = vadd.f32 %v130_v20, %v112_v15  ;;  %v122_v57 = vmul.f32 %v82_v47, %v56_v50  ;;  %v85_v60 = vperm.slane %v65_v55, 0  ;;  %v86_v0 = vperm.slane %v65_v55, 1 }
  0x14   :  { %v123_v61 = vmul.f32 %v83_v51, %v57_v54  ;;  %v124_v1 = vmul.f32 %v84_v56, %v58_v59  ;;  %v88_v4 = vperm.slane %v65_v55, 3  ;;  %v87_v6 = vperm.slane %v65_v55, 2 }
  0x15   :  { %v132_v29 = vadd.f32 %v131_v25, %v113_v19  ;;  %v125_v7 = vmul.f32 %v85_v60, %v59_v63  ;;  %v126_v10 = vmul.f32 %v86_v0, %v60_v3  ;;  %v153_v19 = vstv %s253_s2 }
  0x16   :  { %v128_v12 = vmul.f32 %v88_v4, %v62_v5  ;;  %v127_v13 = vmul.f32 %v87_v6, %v61_v9 }
  0x17   :  { %v133_v33 = vadd.f32 %v132_v29, %v114_v24 }
  0x18   :  { %v148_v16 = vsel %vm147_vm0, %v128_v12, 0.0 }
  0x19   :  { %v134_v37 = vadd.f32 %v133_v33, %v115_v28 }
  0x1b   :  { %v135_v41 = vadd.f32 %v134_v37, %v116_v32 }
  0x1d   :  { %v136_v45 = vadd.f32 %v135_v41, %v117_v36 }
  0x1f   :  { %v137_v49 = vadd.f32 %v136_v45, %v118_v40 }
  0x21   :  { %v138_v53 = vadd.f32 %v137_v49, %v119_v44 }
  0x23   :  { %v139_v58 = vadd.f32 %v138_v53, %v120_v48 }
  0x25   :  { %v140_v62 = vadd.f32 %v139_v58, %v121_v52 }
  0x27   :  { %v141_v2 = vadd.f32 %v140_v62, %v122_v57 }
  0x29   :  { %v142_v8 = vadd.f32 %v141_v2, %v123_v61 }
  0x2b   :  { %v143_v11 = vadd.f32 %v142_v8, %v124_v1 }
  0x2d   :  { %v144_v14 = vadd.f32 %v143_v11, %v125_v7 }
  0x2f   :  { %v145_v15 = vadd.f32 %v144_v14, %v126_v10 }
  0x31   :  { %v146_v17 = vadd.f32 %v145_v15, %v127_v13 }
  0x33   :  { %v149_v18 = vadd.f32 %v148_v16, %v146_v17 }
  0x35   :  { %150 = vadd.xlane.f32.xlu0 %v149_v18 }
  0xa8   :  { %v151_v20 = vpop.xlane.xlu0 %150 }
  0xa9   :  { %v154_v21 = vadd.f32 %v153_v19, %v151_v20 }
  0xab   :  { %156 = vst.msk [vmem:[%s254_s3] sm:$0xff] %vm155_vm1, %v154_v21 }
  0xac   :  { %161 = vsyncpa [#allocation4], 1 }
  0xad   :  { %162 = vsyncpa [#allocation6], 1 }

// kernel: tpu_custom_call.1
= control target key start
LH: loop header
LB: loop body
LE: loop exit
PB: predicated region body
PF: predicated region fallthrough
CT: control target
= control target key end

     0   :  { %9 = vsyncpa [#allocation4], 0  ;;  %s251_s0 = inlined_call_operand.hbm [shape: f32[8,2484], index: 0, kind: input, shape index: {}]   ;;  %s252_s1 = inlined_call_operand.hbm [shape: f32[1,2484], index: 1, kind: input, shape index: {}]   ;;  %s253_s2 = inlined_call_operand.<no memory space> [shape: f32[1], index: 2, kind: input, shape index: {}]   ;;  %s254_s3 = inlined_call_operand.vmem [shape: f32[8,1], index: 3, kind: output, shape index: {}]  }
   0x1   :  { %s16_s14 = sshll.u32 %s251_s0, 4  ;;  %s17_s14 = int_to_ptr.hbm [resolvable:$true] %s16_s14 }
   0x2   :  { %10 = vsyncpa [#allocation6], 0  ;;  %s217_s15 = smov [#allocation3]   ;;  %s27_s19 = sshll.u32 %s252_s1, 4  ;;  %s28_s19 = int_to_ptr.hbm [resolvable:$true] %s27_s19 }
   0x3   :  { %s18_s16 = sshll.u32 %s217_s15, 4  ;;  %s218_s20 = smov [#allocation5]   ;;  %s19_s16 = int_to_ptr.vmem [resolvable:$true] %s18_s16 }
   0x4   :  { %21 = dma.hbm_to_vmem [thread:$0]  %s17_s14, 2560, %s19_s16, [#allocation4]  }
   0x5   :  { %s29_s21 = sshll.u32 %s218_s20, 4  ;;  %s30_s21 = int_to_ptr.vmem [resolvable:$true] %s29_s21 }
   0x6   :  { %32 = dma.hbm_to_vmem [thread:$0]  %s28_s19, 320, %s30_s21, [#allocation6]  }
   0x7   :  { %213 = dma.done.wait [#allocation4], 2560  }
   0x8   :  { %214 = vsyncadd [#allocation4], 4294964736 }
   0x9   :  { %215 = dma.done.wait [#allocation6], 320  }
   0xa   :  { %216 = vsyncadd [#allocation6], 4294966976  ;;  %v63_v0 = vld [vmem:[#allocation5] sm:$0xff]  ;;  %v44_v4 = vld [vmem:[#allocation3 + $0x8] sm:$0xff]  ;;  %vm147_vm0 = vcmask 424960   ;;  %vm155_vm1 = vcmask 7168  }
   0xb   :  { %v69_v1 = vperm.slane %v63_v0, 0  ;;  %v70_v2 = vperm.slane %v63_v0, 1  ;;  %v43_v3 = vld [vmem:[#allocation3] sm:$0xff]  ;;  %v71_v5 = vperm.slane %v63_v0, 2  ;;  %v45_v6 = vld [vmem:[#allocation3 + $0x10] sm:$0xff]  ;;  %v72_v7 = vperm.slane %v63_v0, 3 }
   0xc   :  { %v46_v10 = vld [vmem:[#allocation3 + $0x18] sm:$0xff]  ;;  %v73_v11 = vperm.slane %v63_v0, 4  ;;  %v47_v13 = vld [vmem:[#allocation3 + $0x20] sm:$0xff]  ;;  %v74_v14 = vperm.slane %v63_v0, 5  ;;  %v48_v17 = vld [vmem:[#allocation3 + $0x28] sm:$0xff]  ;;  %v75_v18 = vperm.slane %v63_v0, 6 }
   0xd   :  { %v109_v8 = vmul.f32 %v69_v1, %v43_v3  ;;  %v110_v9 = vmul.f32 %v70_v2, %v44_v4  ;;  %v111_v12 = vmul.f32 %v71_v5, %v45_v6  ;;  %v112_v15 = vmul.f32 %v72_v7, %v46_v10  ;;  %v49_v21 = vld [vmem:[#allocation3 + $0x30] sm:$0xff]  ;;  %v64_v22 = vld [vmem:[#allocation5 + $0x8] sm:$0xff]  ;;  %v50_v26 = vld [vmem:[#allocation3 + $0x38] sm:$0xff] }
   0xe   :  { %v113_v19 = vmul.f32 %v73_v11, %v47_v13  ;;  %v76_v23 = vperm.slane %v63_v0, 7  ;;  %v114_v24 = vmul.f32 %v74_v14, %v48_v17  ;;  %v77_v27 = vperm.slane %v64_v22, 0  ;;  %v51_v30 = vld [vmem:[#allocation3 + $0x40] sm:$0xff]  ;;  %v52_v34 = vld [vmem:[#allocation3 + $0x48] sm:$0xff]  ;;  %v53_v38 = vld [vmem:[#allocation3 + $0x50] sm:$0xff] }
   0xf   :  { %v129_v16 = vadd.f32 %v110_v9, %v109_v8  ;;  %v115_v28 = vmul.f32 %v75_v18, %v49_v21  ;;  %v78_v31 = vperm.slane %v64_v22, 1  ;;  %v79_v35 = vperm.slane %v64_v22, 2  ;;  %v54_v42 = vld [vmem:[#allocation3 + $0x58] sm:$0xff]  ;;  %v55_v46 = vld [vmem:[#allocation3 + $0x60] sm:$0xff]  ;;  %v56_v50 = vld [vmem:[#allocation3 + $0x68] sm:$0xff] }
  0x10   :  { %v116_v32 = vmul.f32 %v76_v23, %v50_v26  ;;  %v117_v36 = vmul.f32 %v77_v27, %v51_v30  ;;  %v80_v39 = vperm.slane %v64_v22, 3  ;;  %v81_v43 = vperm.slane %v64_v22, 4  ;;  %v57_v54 = vld [vmem:[#allocation3 + $0x70] sm:$0xff]  ;;  %v58_v59 = vld [vmem:[#allocation3 + $0x78] sm:$0xff]  ;;  %v59_v63 = vld [vmem:[#allocation3 + $0x80] sm:$0xff] }
  0x11   :  { %v130_v20 = vadd.f32 %v129_v16, %v111_v12  ;;  %v118_v40 = vmul.f32 %v78_v31, %v52_v34  ;;  %v119_v44 = vmul.f32 %v79_v35, %v53_v38  ;;  %v82_v47 = vperm.slane %v64_v22, 5  ;;  %v65_v55 = vld [vmem:[#allocation5 + $0x10] sm:$0xf]  ;;  %v60_v3 = vld [vmem:[#allocation3 + $0x88] sm:$0xff]  ;;  %v62_v5 = vld [vmem:[#allocation3 + $0x98] sm:$0xff] }
  0x12   :  { %v120_v48 = vmul.f32 %v80_v39, %v54_v42  ;;  %v83_v51 = vperm.slane %v64_v22, 6  ;;  %v121_v52 = vmul.f32 %v81_v43, %v55_v46  ;;  %v84_v56 = vperm.slane %v64_v22, 7  ;;  %v61_v9 = vld [vmem:[#allocation3 + $0x90] sm:$0xff] }
  0x13   :  { %v131_v25 = vadd.f32 %v130_v20, %v112_v15  ;;  %v122_v57 = vmul.f32 %v82_v47, %v56_v50  ;;  %v85_v60 = vperm.slane %v65_v55, 0  ;;  %v86_v0 = vperm.slane %v65_v55, 1 }
  0x14   :  { %v123_v61 = vmul.f32 %v83_v51, %v57_v54  ;;  %v124_v1 = vmul.f32 %v84_v56, %v58_v59  ;;  %v88_v4 = vperm.slane %v65_v55, 3  ;;  %v87_v6 = vperm.slane %v65_v55, 2 }
  0x15   :  { %v132_v29 = vadd.f32 %v131_v25, %v113_v19  ;;  %v125_v7 = vmul.f32 %v85_v60, %v59_v63  ;;  %v126_v10 = vmul.f32 %v86_v0, %v60_v3  ;;  %v153_v19 = vstv %s253_s2 }
  0x16   :  { %v128_v12 = vmul.f32 %v88_v4, %v62_v5  ;;  %v127_v13 = vmul.f32 %v87_v6, %v61_v9 }
  0x17   :  { %v133_v33 = vadd.f32 %v132_v29, %v114_v24 }
  0x18   :  { %v148_v16 = vsel %vm147_vm0, %v128_v12, 0.0 }
  0x19   :  { %v134_v37 = vadd.f32 %v133_v33, %v115_v28 }
  0x1b   :  { %v135_v41 = vadd.f32 %v134_v37, %v116_v32 }
  0x1d   :  { %v136_v45 = vadd.f32 %v135_v41, %v117_v36 }
  0x1f   :  { %v137_v49 = vadd.f32 %v136_v45, %v118_v40 }
  0x21   :  { %v138_v53 = vadd.f32 %v137_v49, %v119_v44 }
  0x23   :  { %v139_v58 = vadd.f32 %v138_v53, %v120_v48 }
  0x25   :  { %v140_v62 = vadd.f32 %v139_v58, %v121_v52 }
  0x27   :  { %v141_v2 = vadd.f32 %v140_v62, %v122_v57 }
  0x29   :  { %v142_v8 = vadd.f32 %v141_v2, %v123_v61 }
  0x2b   :  { %v143_v11 = vadd.f32 %v142_v8, %v124_v1 }
  0x2d   :  { %v144_v14 = vadd.f32 %v143_v11, %v125_v7 }
  0x2f   :  { %v145_v15 = vadd.f32 %v144_v14, %v126_v10 }
  0x31   :  { %v146_v17 = vadd.f32 %v145_v15, %v127_v13 }
  0x33   :  { %v149_v18 = vadd.f32 %v148_v16, %v146_v17 }
  0x35   :  { %150 = vadd.xlane.f32.xlu0 %v149_v18 }
  0xa8   :  { %v151_v20 = vpop.xlane.xlu0 %150 }
  0xa9   :  { %v154_v21 = vadd.f32 %v153_v19, %v151_v20 }
  0xab   :  { %156 = vst.msk [vmem:[%s254_s3] sm:$0xff] %vm155_vm1, %v154_v21 }
  0xac   :  { %161 = vsyncpa [#allocation4], 1 }
  0xad   :  { %162 = vsyncpa [#allocation6], 1 }

</bundles_post_ra>
